<compile_context>
chip_gen: v7x
topology: tpu7x:2x2x1
jax: 0.10.0
libtpu: 0.0.40
codegen_flags: <defaults>
</compile_context>

<pallas_src>
import functools

import jax
import jax.numpy as jnp
from jax.experimental import pallas as pl
from jax.experimental.pallas import tpu as pltpu


def _mlp_kernel(x_ref, w0_ref, b0_ref, *rest, n_hidden):
    """rest = (wh_0, bh_0, ..., wh_{n_hidden-1}, bh_{n_hidden-1}, w_last, b_last, out_ref).

    Shapes (per grid step), batch along lanes:
      x_ref:   (1, tb)
      w0_ref:  (W, 1)   -- first layer weight, native PyTorch [out, in]
      b0_ref:  (W, 1)
      wh_i:    (W, W)   -- hidden weights, native [out, in] (no transpose)
      bh_i:    (W, 1)
      w_last:  (W, 1)   -- last layer weight as a column for the reduction
      b_last:  (1, 1)
      out_ref: (1, tb)
    """
    out_ref = rest[-1]
    wl_ref = rest[-3]
    bl_ref = rest[-2]
    hidden_refs = rest[:-3]

    x = x_ref[...].astype(jnp.float32)                       # (1, tb)

    # --- First layer: contraction dim K=1 -> broadcast multiply-add on the VPU.
    h = w0_ref[...] * x + b0_ref[...]                        # (W, tb)
    h = jax.nn.sigmoid(h)                                    # EUP logistic

    # --- Hidden layers: dense (W, W) @ (W, tb) matmuls on the MXU.
    # Static Python loop: D is small here.  TODO(synk): stack hidden weights
    # into a (D-2, W, W) array + lax.fori_loop for very deep nets.
    for i in range(n_hidden):
        w = hidden_refs[2 * i][...]                          # (W, W) [out, in]
        b = hidden_refs[2 * i + 1][...]                      # (W, 1)
        h = jnp.dot(w, h, preferred_element_type=jnp.float32) + b
        h = jax.nn.sigmoid(h)

    # --- Last layer: output dim N=1 -> elementwise mul + sublane reduction.
    out = jnp.sum(h * wl_ref[...], axis=0, keepdims=True) + bl_ref[...]  # (1, tb)
    out_ref[...] = out.astype(out_ref.dtype)


def net_forward(x, params, *, block_b=2048):
    """x: (B, 1) float32.  params: list of (w, b) with PyTorch Linear layout."""
    n_layers = len(params)
    assert n_layers >= 2, "Net always has at least the first and last Linear"
    n_hidden = n_layers - 2
    W = params[0][0].shape[0]            # out_features of the first Linear
    batch = x.shape[0]

    # --- Host-side (one-time, free) weight re-layout --------------------------
    w0, b0 = params[0]
    flat = [w0.reshape(W, 1), b0.reshape(W, 1)]              # (W, 1), (W, 1)
    for w, b in params[1:-1]:
        flat.append(w)                                       # (W, W) native [out, in]
        flat.append(b.reshape(W, 1))                         # (W, 1)
    wl, bl = params[-1]
    flat.append(wl.reshape(W, 1))                            # (W, 1) column for reduce
    flat.append(bl.reshape(1, 1))                            # (1, 1)

    # Batch along lanes: free reshape since the feature dim is 1.
    x_t = x.reshape(1, batch)

    # --- Batch tiling ----------------------------------------------------------
    # Block last dim must be a multiple of 128 or the full extent.
    if batch % block_b != 0 or block_b % 128 != 0:
        block_b = batch
    grid = (batch // block_b,)

    x_spec = pl.BlockSpec((1, block_b), lambda i: (0, i))
    out_spec = pl.BlockSpec((1, block_b), lambda i: (0, i))
    # Params: full-array blocks, same block index every step -> VMEM-resident.
    param_specs = [pl.BlockSpec(p.shape, lambda i: (0, 0)) for p in flat]

    flops = 2 * batch * W * (W * n_hidden + 2)
    transcendentals = batch * W * (n_layers - 1)
    bytes_accessed = 4 * (x.size + batch + sum(int(p.size) for p in flat))
    cost = pl.CostEstimate(
        flops=flops,
        transcendentals=transcendentals,
        bytes_accessed=bytes_accessed,
    )

    kernel = functools.partial(_mlp_kernel, n_hidden=n_hidden)

    out_t = pl.pallas_call(
        kernel,
        out_shape=jax.ShapeDtypeStruct((1, batch), jnp.float32),
        grid_spec=pltpu.PrefetchScalarGridSpec(
            num_scalar_prefetch=0,
            grid=grid,
            in_specs=[x_spec] + param_specs,
            out_specs=out_spec,
        ),
        compiler_params=pltpu.CompilerParams(
            dimension_semantics=("parallel",),   # lets v7x shard the batch grid
        ),
        cost_estimate=cost,
    )(x_t, *flat)

    return out_t.reshape(batch, 1)               # free reshape back to (B, 1)


def init_params(key, D=2, W=2):
    """Deterministic init matching the nn.Linear shapes built in Net.__init__."""
    dims = [(1, W)] + [(W, W)] * (D - 2) + [(W, 1)]
    params = []
    for (fan_in, fan_out) in dims:
        key, kw, kb = jax.random.split(key, 3)
        bound = 1.0 / jnp.sqrt(fan_in)
        w = jax.random.uniform(kw, (fan_out, fan_in), jnp.float32, -bound, bound)
        b = jax.random.uniform(kb, (fan_out,), jnp.float32, -bound, bound)
        params.append((w, b))
    return params


def reference_forward(x, params):
    """Pure-JAX reference with the exact PyTorch nn.Linear convention."""
    h = x
    n = len(params)
    for i, (w, b) in enumerate(params):
        h = h @ w.T + b
        if i < n - 1:
            h = jax.nn.sigmoid(h)
    return h


if __name__ == "__main__":
    key = jax.random.PRNGKey(0)
    D, W = 3, 32                      # 3 Linear layers, hidden width 32
    batch = 256                       # small, but exercises a 2-step grid below

    k_x, k_p = jax.random.split(key)
    x = jax.random.normal(k_x, (batch, 1), jnp.float32)
    params = init_params(k_p, D=D, W=W)

    out = net_forward(x, params, block_b=128)
    out = jax.block_until_ready(out)

    ref = reference_forward(x, params)
    assert out.shape == (batch, 1)
    assert jnp.allclose(out, ref, atol=1e-5, rtol=1e-5)

    print("KERNEL_OK")
</pallas_src>

<mosaic_0001>
module attributes {stable_mosaic.version = 11 : i64} {
  func.func @_mlp_kernel(%arg0: i32, %arg1: memref<1x128xf32, #tpu.memory_space<vmem>>, %arg2: memref<32x1xf32, #tpu.memory_space<vmem>>, %arg3: memref<32x1xf32, #tpu.memory_space<vmem>>, %arg4: memref<32x32xf32, #tpu.memory_space<vmem>>, %arg5: memref<32x1xf32, #tpu.memory_space<vmem>>, %arg6: memref<32x1xf32, #tpu.memory_space<vmem>>, %arg7: memref<1x1xf32, #tpu.memory_space<vmem>>, %arg8: memref<1x128xf32, #tpu.memory_space<vmem>>) attributes {dimension_semantics = [#tpu.dimension_semantics<parallel>], iteration_bounds = array<i64: 2>, scalar_prefetch = 0 : i64, scratch_operands = 0 : i64, tpu.core_type = #tpu.core_type<tc>, window_params = [{transform_indices = @transform_0, window_bounds = array<i64: 1, 128>}, {pipeline_mode = #tpu.pipeline_mode<synchronous>, transform_indices = @transform_1, window_bounds = array<i64: 32, 1>}, {pipeline_mode = #tpu.pipeline_mode<synchronous>, transform_indices = @transform_2, window_bounds = array<i64: 32, 1>}, {pipeline_mode = #tpu.pipeline_mode<synchronous>, transform_indices = @transform_3, window_bounds = array<i64: 32, 32>}, {pipeline_mode = #tpu.pipeline_mode<synchronous>, transform_indices = @transform_4, window_bounds = array<i64: 32, 1>}, {pipeline_mode = #tpu.pipeline_mode<synchronous>, transform_indices = @transform_5, window_bounds = array<i64: 32, 1>}, {pipeline_mode = #tpu.pipeline_mode<synchronous>, transform_indices = @transform_6, window_bounds = array<i64: 1, 1>}, {transform_indices = @transform_7, window_bounds = array<i64: 1, 128>}]} {
    %c0 = arith.constant 0 : index
    %c0_0 = arith.constant 0 : index
    %0 = vector.load %arg1[%c0, %c0_0] : memref<1x128xf32, #tpu.memory_space<vmem>>, vector<1x128xf32>
    %c0_1 = arith.constant 0 : index
    %c0_2 = arith.constant 0 : index
    %1 = vector.load %arg2[%c0_1, %c0_2] : memref<32x1xf32, #tpu.memory_space<vmem>>, vector<32x1xf32>
    %2 = vector.broadcast %1 : vector<32x1xf32> to vector<32x128xf32>
    %3 = vector.broadcast %0 : vector<1x128xf32> to vector<32x128xf32>
    %4 = arith.mulf %2, %3 : vector<32x128xf32>
    %c0_3 = arith.constant 0 : index
    %c0_4 = arith.constant 0 : index
    %5 = vector.load %arg3[%c0_3, %c0_4] : memref<32x1xf32, #tpu.memory_space<vmem>>, vector<32x1xf32>
    %6 = vector.broadcast %5 : vector<32x1xf32> to vector<32x128xf32>
    %7 = arith.addf %4, %6 : vector<32x128xf32>
    %8 = arith.negf %7 : vector<32x128xf32>
    %9 = math.exp %8 : vector<32x128xf32>
    %cst = arith.constant 1.000000e+00 : f32
    %10 = vector.broadcast %cst : f32 to vector<32x128xf32>
    %11 = arith.addf %10, %9 : vector<32x128xf32>
    %12 = arith.divf %10, %11 : vector<32x128xf32>
    %c0_5 = arith.constant 0 : index
    %c0_6 = arith.constant 0 : index
    %13 = vector.load %arg4[%c0_5, %c0_6] : memref<32x32xf32, #tpu.memory_space<vmem>>, vector<32x32xf32>
    %c0_7 = arith.constant 0 : index
    %c0_8 = arith.constant 0 : index
    %14 = vector.load %arg5[%c0_7, %c0_8] : memref<32x1xf32, #tpu.memory_space<vmem>>, vector<32x1xf32>
    %cst_9 = arith.constant dense<0.000000e+00> : vector<32x128xf32>
    %15 = tpu.matmul %13, %12, %cst_9 {dimension_numbers = #tpu.dot_dimension_numbers<[1], [0], [0], [1], [0, 0, 1, 1], [], []>} : vector<32x32xf32>, vector<32x128xf32>, vector<32x128xf32> -> vector<32x128xf32>
    %16 = vector.broadcast %14 : vector<32x1xf32> to vector<32x128xf32>
    %17 = arith.addf %15, %16 : vector<32x128xf32>
    %18 = arith.negf %17 : vector<32x128xf32>
    %19 = math.exp %18 : vector<32x128xf32>
    %cst_10 = arith.constant 1.000000e+00 : f32
    %20 = vector.broadcast %cst_10 : f32 to vector<32x128xf32>
    %21 = arith.addf %20, %19 : vector<32x128xf32>
    %22 = arith.divf %20, %21 : vector<32x128xf32>
    %c0_11 = arith.constant 0 : index
    %c0_12 = arith.constant 0 : index
    %23 = vector.load %arg6[%c0_11, %c0_12] : memref<32x1xf32, #tpu.memory_space<vmem>>, vector<32x1xf32>
    %24 = vector.broadcast %23 : vector<32x1xf32> to vector<32x128xf32>
    %25 = arith.mulf %22, %24 : vector<32x128xf32>
    %cst_13 = arith.constant dense<0.000000e+00> : vector<128xf32>
    %26 = vector.multi_reduction <add>, %25, %cst_13 [0] : vector<32x128xf32> to vector<128xf32>
    %27 = vector.shape_cast %26 : vector<128xf32> to vector<1x128xf32>
    %c0_14 = arith.constant 0 : index
    %c0_15 = arith.constant 0 : index
    %28 = vector.load %arg7[%c0_14, %c0_15] : memref<1x1xf32, #tpu.memory_space<vmem>>, vector<1x1xf32>
    %29 = vector.broadcast %28 : vector<1x1xf32> to vector<1x128xf32>
    %30 = arith.addf %27, %29 : vector<1x128xf32>
    %c0_16 = arith.constant 0 : index
    %c0_17 = arith.constant 0 : index
    %31 = vector.load %arg8[%c0_16, %c0_17] : memref<1x128xf32, #tpu.memory_space<vmem>>, vector<1x128xf32>
    tpu.vector_store %arg8[%c0_16, %c0_17], %30 {strides = array<i32>} : memref<1x128xf32, #tpu.memory_space<vmem>>, vector<1x128xf32>,
    return
  }
  func.func @transform_0(%arg0: i32) -> (i32, i32) {
    %c0_i32 = arith.constant 0 : i32
    %c0_i32_0 = arith.constant 0 : i32
    return %c0_i32, %arg0 : i32, i32
  }
  func.func @transform_1(%arg0: i32) -> (i32, i32) {
    %c0_i32 = arith.constant 0 : i32
    %c0_i32_0 = arith.constant 0 : i32
    %c0_i32_1 = arith.constant 0 : i32
    return %c0_i32, %c0_i32_0 : i32, i32
  }
  func.func @transform_2(%arg0: i32) -> (i32, i32) {
    %c0_i32 = arith.constant 0 : i32
    %c0_i32_0 = arith.constant 0 : i32
    %c0_i32_1 = arith.constant 0 : i32
    return %c0_i32, %c0_i32_0 : i32, i32
  }
  func.func @transform_3(%arg0: i32) -> (i32, i32) {
    %c0_i32 = arith.constant 0 : i32
    %c0_i32_0 = arith.constant 0 : i32
    %c0_i32_1 = arith.constant 0 : i32
    return %c0_i32, %c0_i32_0 : i32, i32
  }
  func.func @transform_4(%arg0: i32) -> (i32, i32) {
    %c0_i32 = arith.constant 0 : i32
    %c0_i32_0 = arith.constant 0 : i32
    %c0_i32_1 = arith.constant 0 : i32
    return %c0_i32, %c0_i32_0 : i32, i32
  }
  func.func @transform_5(%arg0: i32) -> (i32, i32) {
    %c0_i32 = arith.constant 0 : i32
    %c0_i32_0 = arith.constant 0 : i32
    %c0_i32_1 = arith.constant 0 : i32
    return %c0_i32, %c0_i32_0 : i32, i32
  }
  func.func @transform_6(%arg0: i32) -> (i32, i32) {
    %c0_i32 = arith.constant 0 : i32
    %c0_i32_0 = arith.constant 0 : i32
    %c0_i32_1 = arith.constant 0 : i32
    return %c0_i32, %c0_i32_0 : i32, i32
  }
  func.func @transform_7(%arg0: i32) -> (i32, i32) {
    %c0_i32 = arith.constant 0 : i32
    %c0_i32_0 = arith.constant 0 : i32
    return %c0_i32, %arg0 : i32, i32
  }
}

</mosaic_0001>

<bundles_post_ra>
// kernel: tpu_custom_call.1
= control target key start
LH: loop header
LB: loop body
LE: loop exit
PB: predicated region body
PF: predicated region fallthrough
CT: control target
= control target key end

     0   :  { %s1024_s0 = inlined_call_operand.vmem [shape: f32[1,256], index: 0, kind: input, shape index: {}]   ;;  %s1025_s1 = inlined_call_operand.vmem [shape: f32[32,1], index: 1, kind: input, shape index: {}]   ;;  %s1026_s2 = inlined_call_operand.vmem [shape: f32[32,1], index: 2, kind: input, shape index: {}]   ;;  %s1027_s3 = inlined_call_operand.vmem [shape: f32[32,32], index: 3, kind: input, shape index: {}]   ;;  %s1028_s4 = inlined_call_operand.vmem [shape: f32[32,1], index: 4, kind: input, shape index: {}]   ;;  %s1029_s5 = inlined_call_operand.vmem [shape: f32[32,1], index: 5, kind: input, shape index: {}]   ;;  %s1030_s6 = inlined_call_operand.<no memory space> [shape: f32[1,1], index: 6, kind: input, shape index: {}]   ;;  %s1031_s7 = inlined_call_operand.hbm [shape: f32[1,256], index: 7, kind: output, shape index: {}]  }
   0x1   :  { %v12_v0 = vstv %s1030_s6 }
   0x2   :  { %13 = vst [vmem:[#allocation2] sm:$0x1] %v12_v0 }
   0x3   :  { %14 = vsyncpa [#allocation4], 0 }
   0x4   :  { %16 = vsyncpa [#allocation4 + $0x1], 0  ;;  %s860_s26 = smov 0   ;;  %s862_s27 = smov 0  }
   0x5   :  { %s864_s28 = smov 0   ;;  %s866_s29 = smov 0  }
   0x6 LB: > { %s881_s6 = sadd.s32 4294967295, %s813_s29   ;;  %s623_s30 = sadd.s32 4294967294, %s813_s29   ;;  %s813_s29 = sphi %s866_s29, %s1037_s29   ;;  %s809_s28 = sphi %s864_s28, %s1036_s28   ;;  %s805_s27 = sphi %s862_s27, %s1035_s27   ;;  %s801_s26 = sphi %s860_s26, %s1034_s26  }
   0x7   : > { %s885_s8 = sadd.s32 1, %s813_s29   ;;  %s181_s9 = sadd.s32 1, %s809_s28 }
   0x8   : > { %s178_s10 = ssub.s32 %s813_s29, %s885_s8  ;;  %p191_p0 = scmp.ne.s32.totalorder %s809_s28, %s805_s27 }
   0x9   : > { %p179_p1 = scmp.eq.s32.totalorder %s178_s10, 0  ;;  %p192_p2 = scmp.eq.s32.totalorder %s881_s6, 1 }
   0xa   : > { %p197_p3 = scmp.ne.s32.totalorder %s805_s27, %s801_s26  ;;  %p198_p4 = scmp.eq.s32.totalorder %s623_s30, 1 }
   0xb   : > { %s896_s11 = scalar_select %p179_p1, %s809_s28, %s181_s9  }
   0xc   : > { %p898_p5 = por %p192_p2, %p191_p0  ;;  %p902_p6 = por %p198_p4, %p197_p3 }
   0xd   : > { %p626_p7 = scmp.ge.s32.totalorder %s813_s29, 1  ;;  %p240_p8 = scmp.lt.s32.totalorder %s813_s29, 3 }
   0xf   : > { %p241_p9 = pnand %p626_p7, %p240_p8 }
  0x10   : > { %v307_v1 = vld [vmem:[%s1026_s2] sm:$0xff] (!%p241_p9)  ;;  %v815_v3 = vmov (!%p241_p9), 0   ;;  %v308_v4 = vld [vmem:[%s1026_s2 + $0x8] sm:$0xff] (!%p241_p9)  ;;  %v276_v6 = vld [vmem:[%s1025_s1 + $0x18] sm:$0xff] (!%p241_p9)  ;;  %vm387_vm0 = vcmask (!%p241_p9), 261120   ;;  %p269_p10 = scmp.lt.s32.totalorder (!%p241_p9), %s881_s6, 1 }
  0x11   : > { %244 = sbr.rel (%p241_p9) target bundleno = 471 (0x1d7), region = 48  ;;  %v273_v2 = vld [vmem:[%s1025_s1] sm:$0xff] (!%p241_p9)  ;;  %718 = vset.pattern.permute.xlu1 (!%p241_p9), %v815_v3  ;;  %717 = vset.pattern.permute.xlu0 (!%p241_p9), %v815_v3  ;;  %v274_v5 = vld [vmem:[%s1025_s1 + $0x8] sm:$0xff] (!%p241_p9)  ;;  %v275_v7 = vld [vmem:[%s1025_s1 + $0x10] sm:$0xff] (!%p241_p9)  ;;  %s267_s10 = sand.u32 (!%p241_p9), 1, %s805_s27  }
  0x12   : > { %313 = vperm.xlu1 (!%p241_p9), %718, %v307_v1   ;;  %279 = vperm.xlu0 (!%p241_p9), %717, %v273_v2   ;;  %v310_v8 = vld [vmem:[%s1026_s2 + $0x18] sm:$0xff] (!%p241_p9)  ;;  %v309_v9 = vld [vmem:[%s1026_s2 + $0x10] sm:$0xff] (!%p241_p9)  ;;  %v364_v10 = vld [vmem:[%s1028_s4 + $0x8] sm:$0xff] (!%p241_p9)  ;;  %s640_s14 = sshll.u32 (!%p241_p9), %s881_s6, 4  ;;  %s268_s15 = scalar_lea.vmem (!%p241_p9), [#allocation3], %s267_s10 }
  0x13   : > { %v363_v11 = vld [vmem:[%s1028_s4] sm:$0xff] (!%p241_p9)  ;;  %v366_v12 = vld [vmem:[%s1028_s4 + $0x18] sm:$0xff] (!%p241_p9)  ;;  %v365_v13 = vld [vmem:[%s1028_s4 + $0x10] sm:$0xff] (!%p241_p9)  ;;  %s571_s16 = sshll.u32 (!%p241_p9), %s268_s15, 4  ;;  %s982_s19 = scalar_lea.hbm (!%p241_p9), %s1031_s7, %s640_s14  ;;  %s984_s16 = int_to_ptr.vmem [resolvable:$true] %s571_s16 }
  0x14   : > { %v510_v14 = vld [vmem:[%s1029_s5 + $0x8] sm:$0xff] (!%p241_p9)  ;;  %v509_v15 = vld [vmem:[%s1029_s5] sm:$0xff] (!%p241_p9)  ;;  %v512_v16 = vld [vmem:[%s1029_s5 + $0x18] sm:$0xff] (!%p241_p9)  ;;  %s751_s21 = scalar_lea.vmem (!%p241_p9), %s984_s16, 16 }
  0x15   : > { %v511_v17 = vld [vmem:[%s1029_s5 + $0x10] sm:$0xff] (!%p241_p9)  ;;  %v546_v18 = vld [vmem:[#allocation2] sm:$0x1] (!%p241_p9)  ;;  %v360_v56 = vld [vmem:[%s1027_s3 + $0x8] sm:$0xff] (!%p241_p9)  ;;  %p752_p11 = scmp.ne.s32.totalorder (!%p241_p9), %s984_s16, %s751_s21 }
  0x16   : > { %318 = vperm.xlu1 (!%p241_p9), %718, %v308_v4   ;;  %284 = vperm.xlu0 (!%p241_p9), %717, %v274_v5   ;;  %v359_v19 = vld [vmem:[%s1027_s3] sm:$0xff] (!%p241_p9)  ;;  %v361_v20 = vld [vmem:[%s1027_s3 + $0x10] sm:$0xff] (!%p241_p9)  ;;  %v362_v57 = vld [vmem:[%s1027_s3 + $0x18] sm:$0xff] (!%p241_p9) }
  0x17   : > { %659 = vmatprep.mubr.msk.f32.mxu0 (!%p241_p9), %vm387_vm0, %v359_v19  ;;  %662 = vmatprep.mubr.msk.f32.mxu1 (!%p241_p9), %vm387_vm0, %v361_v20  ;;  %p753_p12 = pnand (!%p241_p9), %p752_p11, %p898_p5 }
  0x18   : > { %s270_s20 = scalar_select %p269_p10, %s881_s6, 1 }
  0x19   : > { %p754_p13 = pneg %p753_p12  ;;  %s816_s6 = smov [#allocation3]  }
  0x1a   : > { %294 = vperm.xlu1 %718, %v276_v6   ;;  %289 = vperm.xlu0 %717, %v275_v7   ;;  %s271_s23 = scalar_lea.vmem %s1024_s0, %s270_s20  ;;  %s559_s20 = scalar_lea.sflag [#allocation4], %s267_s10 }
  0x1b   : > { %v627_v21 = vld [vmem:[%s271_s23] ss:$0 sm:$0xff]  ;;  %s755_s22 = sshll.u32 %s816_s6, 4  ;;  %s756_s22 = int_to_ptr.vmem [resolvable:$false] %s755_s22 }
  0x1c   : > { %s757_s23 = scalar_lea.vmem %s756_s22, 32  ;;  %p758_p0 = scmp.lt.s32.totalorder %s984_s16, %s756_s22 }
  0x1d   : > { %p759_p1 = scmp.lt.s32.totalorder %s757_s23, %s751_s21 }
  0x1e   : > { %328 = vperm.xlu1 %718, %v310_v8   ;;  %323 = vperm.xlu0 %717, %v309_v9  }
  0x1f   : > { %p760_p2 = por %p759_p1, %p758_p0 }
  0x21   : > { %p761_p3 = pnand %p760_p2, %p754_p13 }
  0x22   : > { %374 = vperm.xlu1 %718, %v364_v10   ;;  %369 = vperm.xlu0 %717, %v363_v11  }
  0x26   : > { %384 = vperm.xlu1 %718, %v366_v12   ;;  %379 = vperm.xlu0 %717, %v365_v13  }
  0x2a   : > { %520 = vperm.xlu1 %718, %v510_v14   ;;  %515 = vperm.xlu0 %717, %v509_v15  }
  0x2e   : > { %530 = vperm.xlu1 %718, %v512_v16   ;;  %525 = vperm.xlu0 %717, %v511_v17  }
  0x32   : > { %549 = vperm.xlu0 %717, %v546_v18  }
  0x91   : > { %v314_v22 = vpop.permute.xlu1 %313  ;;  %v280_v23 = vpop.permute.xlu0 %279 }
  0x92   : > { %v303_v24 = vmul.f32 %v627_v21, %v280_v23 }
  0x94   : > { %v331_v25 = vadd.f32 %v314_v22, %v303_v24 }
  0x95   : > { %v319_v26 = vpop.permute.xlu1 %318  ;;  %v285_v27 = vpop.permute.xlu0 %284 }
  0x96   : > { %v628_v28 = vmul.f32 -1.442695, %v331_v25  ;;  %v304_v29 = vmul.f32 %v627_v21, %v285_v27 }
  0x98   : > { %719 = vpow2.f32 %v628_v28  ;;  %v332_v30 = vadd.f32 %v319_v26, %v304_v29 }
  0x99   : > { %v295_v31 = vpop.permute.xlu1 %294  ;;  %v290_v32 = vpop.permute.xlu0 %289 }
  0x9a   : > { %v629_v33 = vmul.f32 -1.442695, %v332_v30  ;;  %v306_v34 = vmul.f32 %v627_v21, %v295_v31  ;;  %v305_v35 = vmul.f32 %v627_v21, %v290_v32  ;;  %v552_v32 = vlaneseq }
  0x9c   : > { %721 = vpow2.f32 %v629_v33 }
  0x9d   : > { %v329_v36 = vpop.permute.xlu1 %328  ;;  %v324_v37 = vpop.permute.xlu0 %323 }
  0x9e   : > { %v334_v38 = vadd.f32 %v329_v36, %v306_v34  ;;  %v333_v39 = vadd.f32 %v324_v37, %v305_v35  ;;  %v553_v35 = vshrl.u32 %v552_v32, 7 }
  0xa0   : > { %v631_v40 = vmul.f32 -1.442695, %v334_v38  ;;  %v630_v41 = vmul.f32 -1.442695, %v333_v39  ;;  %v554_v38 = vsub.s32 0, %v553_v35 }
  0xa1   : > { %v375_v58 = vpop.permute.xlu1 %374  ;;  %v370_v59 = vpop.permute.xlu0 %369 }
  0xa2   : > { %v720_v42 = vpop.eup %719  ;;  %723 = vpow2.f32 %v631_v40 }
  0xa3   : > { %725 = vpow2.f32 %v630_v41  ;;  %v347_v43 = vadd.f32 1.0, %v720_v42 }
  0xa5   : > { %727 = vrcp.f32 %v347_v43  ;;  %v385_v60 = vpop.permute.xlu1 %384  ;;  %v380_v61 = vpop.permute.xlu0 %379 }
  0xa6   : > { %v722_v44 = vpop.eup %721 }
  0xa7   : > { %v348_v45 = vadd.f32 1.0, %v722_v44 }
  0xa9   : > { %729 = vrcp.f32 %v348_v45  ;;  %v516_v18 = vpop.permute.xlu0 %515  ;;  %v521_v20 = vpop.permute.xlu1 %520 }
  0xac   : > { %v724_v46 = vpop.eup %723 }
  0xad   : > { %v726_v47 = vpop.eup %725  ;;  %v350_v48 = vadd.f32 1.0, %v724_v46  ;;  %v526_v26 = vpop.permute.xlu0 %525 }
  0xae   : > { %v349_v49 = vadd.f32 1.0, %v726_v47  ;;  %v531_v29 = vpop.permute.xlu1 %530 }
  0xaf   : > { %731 = vrcp.f32 %v350_v48  ;;  %v728_v50 = vpop.eup %727 }
  0xb0   : > { %733 = vrcp.f32 %v349_v49 }
  0xb1   : > { %v550_v40 = vpop.permute.xlu0 %549 }
  0xb2   : > { %v555_v42 = vrot.slane %v550_v40, %v554_v38 }
  0xb3   : > { %v730_v51 = vpop.eup %729 }
  0xb4   : > { %v665_v52 = vpack.c.bf16 %v730_v51, %v728_v50 }
  0xb6   : > { %666 = vmatprep.subr.bf16.mxu0 %v665_v52  ;;  %673 = vmatprep.subr.bf16.mxu1 %v665_v52 }
  0xb7   : > { %668 = vmatpush3.bf16.msra.mxu0 %v665_v52  ;;  %675 = vmatpush3.bf16.msra.mxu1 %v665_v52 }
  0xb9   : > { %v732_v53 = vpop.eup %731 }
  0xba   : > { %v734_v54 = vpop.eup %733 }
  0xbb   : > { %v669_v55 = vpack.c.bf16 %v732_v53, %v734_v54 }
  0xbd   : > { %670 = vmatprep.subr.bf16.mxu0 %v669_v55  ;;  %674 = vmatprep.subr.bf16.mxu1 %v669_v55 }
  0xbe   : > { %672 = vmatpush3.bf16.msra.mxu0 %v669_v55  ;;  %676 = vmatpush3.bf16.msra.mxu1 %v669_v55 }
  0xc1   : > { %660 = vmatmul.mubr.msk.f32.vlgmr.msra.gmra.mrb[0].mxu0 %vm387_vm0, %v360_v56  ;;  %663 = vmatmul.mubr.msk.f32.vlgmr.msra.gmra.mrb[0].mxu1 %vm387_vm0, %v362_v57 }
 0x194   : > { %v661_v62 = vpop.f32.mrb[0].mxu0  ;;  %v664_v63 = vpop.f32.mrb[0].mxu1 }
 0x195   : > { %v472_v0 = vadd.f32 %v661_v62, %v375_v58  ;;  %v482_v1 = vadd.f32 %v664_v63, %v385_v60  ;;  %v466_v2 = vpop.f32.mrb[1].mxu0  ;;  %v476_v3 = vpop.f32.mrb[1].mxu1 }
 0x196   : > { %v467_v4 = vadd.f32 %v466_v2, %v370_v59  ;;  %v477_v5 = vadd.f32 %v476_v3, %v380_v61 }
 0x197   : > { %v637_v6 = vmul.f32 -1.442695, %v472_v0  ;;  %v639_v7 = vmul.f32 -1.442695, %v482_v1 }
 0x198   : > { %v636_v8 = vmul.f32 -1.442695, %v467_v4  ;;  %v638_v9 = vmul.f32 -1.442695, %v477_v5 }
 0x199   : > { %735 = vpow2.f32 %v637_v6 }
 0x19a   : > { %737 = vpow2.f32 %v639_v7 }
 0x19b   : > { %739 = vpow2.f32 %v636_v8 }
 0x19c   : > { %741 = vpow2.f32 %v638_v9 }
 0x1a3   : > { %v736_v10 = vpop.eup %735 }
 0x1a4   : > { %v738_v11 = vpop.eup %737  ;;  %v498_v12 = vadd.f32 1.0, %v736_v10 }
 0x1a5   : > { %v740_v13 = vpop.eup %739  ;;  %v500_v15 = vadd.f32 1.0, %v738_v11 }
 0x1a6   : > { %v742_v14 = vpop.eup %741  ;;  %743 = vrcp.f32 %v498_v12  ;;  %v497_v16 = vadd.f32 1.0, %v740_v13 }
 0x1a7   : > { %v499_v17 = vadd.f32 1.0, %v742_v14 }
 0x1a8   : > { %745 = vrcp.f32 %v497_v16 }
 0x1a9   : > { %747 = vrcp.f32 %v499_v17 }
 0x1aa   : > { %749 = vrcp.f32 %v500_v15 }
 0x1b0   : > { %v744_v19 = vpop.eup %743 }
 0x1b1   : > { %v534_v21 = vmul.f32 %v744_v19, %v521_v20 }
 0x1b2   : > { %v746_v22 = vpop.eup %745 }
 0x1b3   : > { %v748_v23 = vpop.eup %747  ;;  %v533_v24 = vmul.f32 %v746_v22, %v516_v18 }
 0x1b4   : > { %v750_v25 = vpop.eup %749  ;;  %v535_v27 = vmul.f32 %v748_v23, %v526_v26 }
 0x1b5   : > { %v537_v28 = vadd.f32 %v534_v21, %v533_v24  ;;  %v536_v30 = vmul.f32 %v750_v25, %v531_v29 }
 0x1b7   : > { %v538_v31 = vadd.f32 %v537_v28, %v535_v27 }
 0x1b9   : > { %v539_v33 = vadd.f32 %v538_v31, %v536_v30 }
 0x1bb   : > { %v540_v34 = vrot.slane %v539_v33, 4 }
 0x1bd   : > { %v541_v36 = vadd.f32 %v540_v34, %v539_v33 }
 0x1bf   : > { %v542_v37 = vrot.slane %v541_v36, 2 }
 0x1c1   : > { %v543_v39 = vadd.f32 %v542_v37, %v541_v36 }
 0x1c3   : > { %v544_v41 = vrot.slane %v543_v39, 1 }
 0x1c5   : > { %v545_v43 = vadd.f32 %v544_v41, %v543_v39 }
 0x1c7   : > { %v556_v44 = vadd.f32 %v555_v42, %v545_v43 }
 0x1c9   : > { %557 = vst [vmem:[%s268_s15] sm:$0x1] %v556_v44 }
 0x1ca   : > { %764 = shalt.err (!%p761_p3)
}
 0x1cb   : > { %s765_s24 = scalar_lea.hbm %s982_s19, 16  ;;  %s769_s9 = scalar_lea.hbm %s1031_s7, 32 }
 0x1cc   : > { %p766_p4 = scmp.ne.s32.totalorder %s982_s19, %s765_s24  ;;  %p770_p9 = scmp.lt.u32.totalorder %s982_s19, %s1031_s7 }
 0x1cd   : > { %p771_p10 = scmp.lt.u32.totalorder %s769_s9, %s765_s24  ;;  %p773_p12 = scmp.lt.u32.totalorder %s765_s24, %s982_s19 }
 0x1ce   : > { %p767_p7 = pnand %p766_p4, %p898_p5 }
 0x1cf   : > { %p772_p11 = por %p771_p10, %p770_p9 }
 0x1d0   : > { %p768_p8 = pneg %p767_p7 }
 0x1d1   : > { %p774_p13 = por %p773_p12, %p772_p11 }
 0x1d3   : > { %p775_p0 = pnand %p774_p13, %p768_p8 }
 0x1d5   : > { %778 = shalt.err (!%p775_p0)
}
 0x1d6   : > { %677 = dma.vmem_to_hbm [thread:$0]  (%p898_p5), %s984_s16, 16, %s982_s19, %s559_s20  }
 0x1d7 PF: > { %p683_p1 = scmp.ge.s32.totalorder %s813_s29, 2  ;;  %s583_s15 = sand.u32 1, %s801_s26  }
 0x1d8   : > { %s584_s17 = scalar_lea.sflag [#allocation4], %s583_s15 }
 0x1d9   : > { %p680_p2 = pnand %p683_p1, %p902_p6 }
 0x1db   : > { %796 = dma.done.wait (!%p680_p2), %s584_s17, 16  }
 0x1dc   : > { %798 = vsyncadd (!%p680_p2), %s584_s17, 4294967280  ;;  %p19_p3 = scmp.ge.s32.totalorder %s885_s8, 4   ;;  %s1034_s26 = smov %s805_s27 }
 0x1dd   : > { %s1035_s27 = smov %s809_s28  ;;  %s1036_s28 = smov %s896_s11 }
 0x1de   : > { %s1037_s29 = smov %s885_s8  ;;  %21 = sbr.rel (!%p19_p3) target bundleno = 6 (0x6), region = 83 }
 0x1e5   :  { %588 = vsyncpa [#allocation4], 1 }
 0x1e6   :  { %590 = vsyncpa [#allocation4 + $0x1], 1 }

</bundles_post_ra>
